<compile_context>
chip_gen: v6e
topology: v6e:2x2x1
jax: 0.10.0
libtpu: 0.0.40
codegen_flags: <defaults>
</compile_context>

<pallas_src>
import functools

import jax
import jax.numpy as jnp
from jax.experimental import pallas as pl
from jax.experimental.pallas import tpu as pltpu


def _ensemble_mlp_kernel(x_ref, w1_ref, w2_ref, bias_ref, o_ref, *, E, H, D_out):
    # x_ref   : (B, D_in)              shared input
    # w1_ref  : (D_in, E*H)            member-major packed layer-1 weights
    # w2_ref  : (E, H, D_out)          per-member layer-2 weights
    # bias_ref: (1, E*H + E*D_out)     [b1 | b2] concatenated
    # o_ref   : (B, E*D_out)           lane-dense output slab
    x = x_ref[...]
    w1 = w1_ref[...]
    b1 = bias_ref[:, : E * H]            # (1, E*H)
    b2 = bias_ref[:, E * H:]             # (1, E*D_out)

    # Layer 1 fused across all ensemble members: one lane-dense MXU pass.
    h = jnp.dot(x, w1, preferred_element_type=jnp.float32) + b1
    h = jnp.maximum(h, 0.0)              # ReLU on the whole (B, E*H) slab

    # Layer 2: one small dot per member (E is a static Python constant,
    # loop unrolls at trace time).
    outs = []
    for e in range(E):
        h_e = h[:, e * H:(e + 1) * H]                       # (B, H)
        y_e = jnp.dot(h_e, w2_ref[e],
                      preferred_element_type=jnp.float32)   # (B, D_out)
        outs.append(y_e)
    y = jnp.concatenate(outs, axis=-1) + b2                  # (B, E*D_out)

    o_ref[...] = y.astype(o_ref.dtype)   # single unmasked, lane-dense store


def ensemble_forward(x, w1, b1, w2, b2):
    """Vectorized ensemble forward.

    x : (B, D_in)       shared input
    w1: (E, D_in, H)    b1: (E, H)
    w2: (E, H, D_out)   b2: (E, D_out)
    returns (E, B, D_out)
    """
    E, D_in, H = w1.shape
    _, _, D_out = w2.shape
    B = x.shape[0]

    # Host-side repacking (layout plumbing, done once outside the kernel):
    #   W1: (E, D_in, H) -> (D_in, E*H), column block e holds member e.
    w1_cat = jnp.transpose(w1, (1, 0, 2)).reshape(D_in, E * H)
    #   Biases concatenated into a single operand: [b1_flat | b2_flat].
    bias_cat = jnp.concatenate(
        [b1.reshape(1, E * H), b2.reshape(1, E * D_out)], axis=-1)

    kernel = functools.partial(_ensemble_mlp_kernel, E=E, H=H, D_out=D_out)

    out_flat = pl.pallas_call(
        kernel,
        out_shape=jax.ShapeDtypeStruct((B, E * D_out), jnp.float32),
        grid=(1,),
        in_specs=[
            pl.BlockSpec((B, D_in), lambda i: (0, 0)),                 # x
            pl.BlockSpec((D_in, E * H), lambda i: (0, 0)),             # W1 packed
            pl.BlockSpec((E, H, D_out), lambda i: (0, 0, 0)),          # W2
            pl.BlockSpec((1, E * H + E * D_out), lambda i: (0, 0)),    # biases
        ],
        out_specs=pl.BlockSpec((B, E * D_out), lambda i: (0, 0)),
        compiler_params=pltpu.CompilerParams(
            dimension_semantics=("arbitrary",)),
    )(x, w1_cat, w2, bias_cat)

    # Back to the vmap output convention (E, B, D_out).
    return jnp.transpose(out_flat.reshape(B, E, D_out), (1, 0, 2))


def _init_params(key, E, D_in, H, D_out):
    """Deterministic init mimicking torch.nn.Linear default U[-1/sqrt(fan_in), +]."""
    k1, k2, k3, k4 = jax.random.split(key, 4)
    lim1 = 1.0 / (D_in ** 0.5)
    lim2 = 1.0 / (H ** 0.5)
    w1 = jax.random.uniform(k1, (E, D_in, H), jnp.float32, -lim1, lim1)
    b1 = jax.random.uniform(k2, (E, H), jnp.float32, -lim1, lim1)
    w2 = jax.random.uniform(k3, (E, H, D_out), jnp.float32, -lim2, lim2)
    b2 = jax.random.uniform(k4, (E, D_out), jnp.float32, -lim2, lim2)
    return w1, b1, w2, b2


if __name__ == "__main__":
    # Small shapes consistent with the module: ensemble of 3 MLPs, batch 8.
    E, B, D_in, H, D_out = 3, 8, 32, 64, 32

    key = jax.random.PRNGKey(0)
    kx, kp = jax.random.split(key)
    x = jax.random.normal(kx, (B, D_in), jnp.float32)
    w1, b1, w2, b2 = _init_params(kp, E, D_in, H, D_out)

    out = ensemble_forward(x, w1, b1, w2, b2)
    out = jax.block_until_ready(out)

    # Reference (plain JAX) check of the vmap-over-params semantics.
    h_ref = jnp.maximum(jnp.einsum("bi,eih->ebh", x, w1) + b1[:, None, :], 0.0)
    ref = jnp.einsum("ebh,eho->ebo", h_ref, w2) + b2[:, None, :]
    assert out.shape == (E, B, D_out)
    assert jnp.allclose(out, ref, atol=1e-5, rtol=1e-5)

    print("KERNEL_OK")
</pallas_src>

<mosaic_0001>
module attributes {stable_mosaic.version = 11 : i64} {
  func.func @_ensemble_mlp_kernel(%arg0: i32, %arg1: memref<8x32xf32, #tpu.memory_space<vmem>>, %arg2: memref<32x192xf32, #tpu.memory_space<vmem>>, %arg3: memref<3x64x32xf32, #tpu.memory_space<vmem>>, %arg4: memref<1x288xf32, #tpu.memory_space<vmem>>, %arg5: memref<8x96xf32, #tpu.memory_space<vmem>>) attributes {dimension_semantics = [#tpu.dimension_semantics<arbitrary>], iteration_bounds = array<i64: 1>, scalar_prefetch = 0 : i64, scratch_operands = 0 : i64, tpu.core_type = #tpu.core_type<tc>, window_params = [{pipeline_mode = #tpu.pipeline_mode<synchronous>, transform_indices = @transform_0, window_bounds = array<i64: 8, 32>}, {pipeline_mode = #tpu.pipeline_mode<synchronous>, transform_indices = @transform_1, window_bounds = array<i64: 32, 192>}, {pipeline_mode = #tpu.pipeline_mode<synchronous>, transform_indices = @transform_2, window_bounds = array<i64: 3, 64, 32>}, {pipeline_mode = #tpu.pipeline_mode<synchronous>, transform_indices = @transform_3, window_bounds = array<i64: 1, 288>}, {pipeline_mode = #tpu.pipeline_mode<synchronous>, transform_indices = @transform_4, window_bounds = array<i64: 8, 96>}]} {
    %c0 = arith.constant 0 : index
    %c0_0 = arith.constant 0 : index
    %0 = vector.load %arg1[%c0, %c0_0] : memref<8x32xf32, #tpu.memory_space<vmem>>, vector<8x32xf32>
    %c0_1 = arith.constant 0 : index
    %c0_2 = arith.constant 0 : index
    %1 = vector.load %arg2[%c0_1, %c0_2] : memref<32x192xf32, #tpu.memory_space<vmem>>, vector<32x192xf32>
    %c0_3 = arith.constant 0 : index
    %c0_4 = arith.constant 0 : index
    %2 = vector.load %arg4[%c0_3, %c0_4] : memref<1x288xf32, #tpu.memory_space<vmem>>, vector<1x192xf32>
    %c0_5 = arith.constant 0 : index
    %c192 = arith.constant 192 : index
    %3 = vector.load %arg4[%c0_5, %c192] : memref<1x288xf32, #tpu.memory_space<vmem>>, vector<1x96xf32>
    %cst = arith.constant dense<0.000000e+00> : vector<8x192xf32>
    %4 = tpu.matmul %0, %1, %cst {dimension_numbers = #tpu.dot_dimension_numbers<[1], [0], [0], [1], [0, 0, 1, 1], [], []>} : vector<8x32xf32>, vector<32x192xf32>, vector<8x192xf32> -> vector<8x192xf32>
    %5 = vector.broadcast %2 : vector<1x192xf32> to vector<8x192xf32>
    %6 = arith.addf %4, %5 : vector<8x192xf32>
    %cst_6 = arith.constant 0.000000e+00 : f32
    %7 = vector.broadcast %cst_6 : f32 to vector<8x192xf32>
    %8 = arith.maximumf %6, %7 : vector<8x192xf32>
    %9 = vector.extract_strided_slice %8 {offsets = [0, 0], sizes = [8, 64], strides = [1, 1]} : vector<8x192xf32> to vector<8x64xf32>
    %c0_7 = arith.constant 0 : index
    %c0_8 = arith.constant 0 : index
    %c0_9 = arith.constant 0 : index
    %10 = vector.load %arg3[%c0_7, %c0_8, %c0_9] : memref<3x64x32xf32, #tpu.memory_space<vmem>>, vector<1x64x32xf32>
    %11 = vector.shape_cast %10 : vector<1x64x32xf32> to vector<64x32xf32>
    %cst_10 = arith.constant dense<0.000000e+00> : vector<8x32xf32>
    %12 = tpu.matmul %9, %11, %cst_10 {dimension_numbers = #tpu.dot_dimension_numbers<[1], [0], [0], [1], [0, 0, 1, 1], [], []>} : vector<8x64xf32>, vector<64x32xf32>, vector<8x32xf32> -> vector<8x32xf32>
    %13 = vector.extract_strided_slice %8 {offsets = [0, 64], sizes = [8, 64], strides = [1, 1]} : vector<8x192xf32> to vector<8x64xf32>
    %c1 = arith.constant 1 : index
    %c0_11 = arith.constant 0 : index
    %c0_12 = arith.constant 0 : index
    %14 = vector.load %arg3[%c1, %c0_11, %c0_12] : memref<3x64x32xf32, #tpu.memory_space<vmem>>, vector<1x64x32xf32>
    %15 = vector.shape_cast %14 : vector<1x64x32xf32> to vector<64x32xf32>
    %cst_13 = arith.constant dense<0.000000e+00> : vector<8x32xf32>
    %16 = tpu.matmul %13, %15, %cst_13 {dimension_numbers = #tpu.dot_dimension_numbers<[1], [0], [0], [1], [0, 0, 1, 1], [], []>} : vector<8x64xf32>, vector<64x32xf32>, vector<8x32xf32> -> vector<8x32xf32>
    %17 = vector.extract_strided_slice %8 {offsets = [0, 128], sizes = [8, 64], strides = [1, 1]} : vector<8x192xf32> to vector<8x64xf32>
    %c2 = arith.constant 2 : index
    %c0_14 = arith.constant 0 : index
    %c0_15 = arith.constant 0 : index
    %18 = vector.load %arg3[%c2, %c0_14, %c0_15] : memref<3x64x32xf32, #tpu.memory_space<vmem>>, vector<1x64x32xf32>
    %19 = vector.shape_cast %18 : vector<1x64x32xf32> to vector<64x32xf32>
    %cst_16 = arith.constant dense<0.000000e+00> : vector<8x32xf32>
    %20 = tpu.matmul %17, %19, %cst_16 {dimension_numbers = #tpu.dot_dimension_numbers<[1], [0], [0], [1], [0, 0, 1, 1], [], []>} : vector<8x64xf32>, vector<64x32xf32>, vector<8x32xf32> -> vector<8x32xf32>
    %21 = tpu.concatenate %12, %16, %20 in 1 : vector<8x32xf32>, vector<8x32xf32>, vector<8x32xf32> -> vector<8x96xf32>
    %22 = vector.broadcast %3 : vector<1x96xf32> to vector<8x96xf32>
    %23 = arith.addf %21, %22 : vector<8x96xf32>
    %c0_17 = arith.constant 0 : index
    %c0_18 = arith.constant 0 : index
    %24 = vector.load %arg5[%c0_17, %c0_18] : memref<8x96xf32, #tpu.memory_space<vmem>>, vector<8x96xf32>
    tpu.vector_store %arg5[%c0_17, %c0_18], %23 {strides = array<i32>} : memref<8x96xf32, #tpu.memory_space<vmem>>, vector<8x96xf32>,
    return
  }
  func.func @transform_0(%arg0: i32) -> (i32, i32) {
    %c0_i32 = arith.constant 0 : i32
    %c0_i32_0 = arith.constant 0 : i32
    %c0_i32_1 = arith.constant 0 : i32
    return %c0_i32, %c0_i32_0 : i32, i32
  }
  func.func @transform_1(%arg0: i32) -> (i32, i32) {
    %c0_i32 = arith.constant 0 : i32
    %c0_i32_0 = arith.constant 0 : i32
    %c0_i32_1 = arith.constant 0 : i32
    return %c0_i32, %c0_i32_0 : i32, i32
  }
  func.func @transform_2(%arg0: i32) -> (i32, i32, i32) {
    %c0_i32 = arith.constant 0 : i32
    %c0_i32_0 = arith.constant 0 : i32
    %c0_i32_1 = arith.constant 0 : i32
    %c0_i32_2 = arith.constant 0 : i32
    return %c0_i32, %c0_i32_0, %c0_i32_1 : i32, i32, i32
  }
  func.func @transform_3(%arg0: i32) -> (i32, i32) {
    %c0_i32 = arith.constant 0 : i32
    %c0_i32_0 = arith.constant 0 : i32
    %c0_i32_1 = arith.constant 0 : i32
    return %c0_i32, %c0_i32_0 : i32, i32
  }
  func.func @transform_4(%arg0: i32) -> (i32, i32) {
    %c0_i32 = arith.constant 0 : i32
    %c0_i32_0 = arith.constant 0 : i32
    %c0_i32_1 = arith.constant 0 : i32
    return %c0_i32, %c0_i32_0 : i32, i32
  }
}

</mosaic_0001>

<bundles_post_ra>
// kernel: tpu_custom_call.1
= control target key start
LH: loop header
LB: loop body
LE: loop exit
PB: predicated region body
PF: predicated region fallthrough
CT: control target
= control target key end

     0   :  { %v537_v4 = vmov 0.0   ;;  %s717_s0 = inlined_call_operand.vmem [shape: f32[8,32], index: 0, kind: input, shape index: {}]   ;;  %s718_s1 = inlined_call_operand.vmem [shape: f32[32,192], index: 1, kind: input, shape index: {}]   ;;  %s719_s2 = inlined_call_operand.vmem [shape: f32[3,64,32], index: 2, kind: input, shape index: {}]   ;;  %s720_s3 = inlined_call_operand.vmem [shape: f32[1,288], index: 3, kind: input, shape index: {}]   ;;  %s721_s4 = inlined_call_operand.hbm [shape: f32[8,96], index: 4, kind: output, shape index: {}]  }
   0x1   :  { %v26_v0 = vld [vmem:[%s718_s1 + $0x38] sm:$0xff]  ;;  %v25_v1 = vld [vmem:[%s718_s1 + $0x30] sm:$0xff]  ;;  %v24_v2 = vld [vmem:[%s718_s1 + $0x28] sm:$0xff]  ;;  %108 = vmatprep.mubr.f32.mxu0 %v537_v4  ;;  %453 = vmatprep.subr.mxu1 %v537_v4 }
   0x2   :  { %68 = vmatprep.subr.mxu0 %v26_v0  ;;  %v23_v3 = vld [vmem:[%s718_s1 + $0x20] sm:$0xff]  ;;  %v22_v5 = vld [vmem:[%s718_s1 + $0x18] sm:$0xff]  ;;  %v21_v6 = vld [vmem:[%s718_s1 + $0x10] sm:$0xff] }
   0x3   :  { %69 = vmatpush1.msra.mxu0 %v25_v1  ;;  %v124_v7 = vld [vmem:[%s719_s2 + $0x38] sm:$0xff]  ;;  %v123_v8 = vld [vmem:[%s719_s2 + $0x30] sm:$0xff]  ;;  %v20_v9 = vld [vmem:[%s718_s1 + $0x8] sm:$0xff] }
   0x4   :  { %70 = vmatprep.subr.mxu0 %v24_v2  ;;  %454 = vmatpush3.msra.mxu1 %v124_v7  ;;  %v19_v10 = vld [vmem:[%s718_s1] sm:$0xff]  ;;  %v122_v11 = vld [vmem:[%s719_s2 + $0x28] sm:$0xff] }
   0x5   :  { %71 = vmatpush1.msra.mxu0 %v23_v3  ;;  %455 = vmatprep.subr.mxu1 %v537_v4 }
   0x6   :  { %72 = vmatprep.subr.mxu0 %v22_v5 }
   0x7   :  { %9 = vsyncpa [#allocation3], 0  ;;  %73 = vmatpush1.msra.mxu0 %v21_v6  ;;  %v18_v12 = vld [vmem:[%s717_s0] sm:$0xff]  ;;  %vm40_vm0 = vcmask 261120   ;;  %456 = vmatpush3.msra.mxu1 %v123_v8  ;;  %v120_v14 = vld [vmem:[%s719_s2 + $0x18] sm:$0xff]  ;;  %vm538_vm1 = vmmov 0   ;;  %v30_v26 = vlaneseq }
   0x8   :  { %74 = vmatprep.subr.mxu0 %v20_v9  ;;  %457 = vmatprep.subr.mxu1 %v537_v4  ;;  %v121_v13 = vld [vmem:[%s719_s2 + $0x20] sm:$0xff]  ;;  %v119_v15 = vld [vmem:[%s719_s2 + $0x10] sm:$0xff]  ;;  %v118_v16 = vld [vmem:[%s719_s2 + $0x8] sm:$0xff]  ;;  %vm125_vm2 = vcmask 523264   ;;  %s539_s1 = smov 64   ;;  %vm390_vm3 = vcmask 785408  }
   0x9   :  { %75 = vmatpush1.msra.mxu0 %v19_v10  ;;  %458 = vmatpush3.msra.mxu1 %v122_v11  ;;  %v117_v17 = vld [vmem:[%s719_s2] sm:$0xff]  ;;  %v415_v18 = vld [vmem:[%s719_s2 + $0x78] sm:$0xff]  ;;  %v414_v19 = vld [vmem:[%s719_s2 + $0x70] sm:$0xff]  ;;  %v31_v27 = vshrl.u32 %v30_v26, 7 }
   0xa   :  { %406 = vmatmul.mubr.msk.f32.vlgmr.msra.gmra.mxu0 %vm40_vm0, %v18_v12  ;;  %459 = vmatprep.subr.mxu1 %v537_v4  ;;  %v413_v20 = vld [vmem:[%s719_s2 + $0x68] sm:$0xff]  ;;  %v412_v21 = vld [vmem:[%s719_s2 + $0x60] sm:$0xff]  ;;  %v411_v22 = vld [vmem:[%s719_s2 + $0x58] sm:$0xff] }
   0xb   :  { %460 = vmatpush3.msra.mxu1 %v121_v13  ;;  %472 = vmatprep.subr.mxu0 %v537_v4  ;;  %v410_v23 = vld [vmem:[%s719_s2 + $0x50] sm:$0xff]  ;;  %v409_v24 = vld [vmem:[%s719_s2 + $0x48] sm:$0xff]  ;;  %v408_v25 = vld [vmem:[%s719_s2 + $0x40] sm:$0xff]  ;;  %v32_v28 = vsub.s32 0, %v31_v27  ;;  %v36_v36 = vsub.s32 1, %v31_v27 }
   0xc   :  { %461 = vmatprep.subr.mxu1 %v537_v4  ;;  %469 = vmatprep.mubr.msk.f32.mxu1 %vm538_vm1, %v537_v4  ;;  %v27_v29 = vld [vmem:[%s720_s3] sm:$0x3]  ;;  %v424_v34 = vld [vmem:[%s719_s2 + $0xb8] sm:$0xff]  ;;  %v423_v35 = vld [vmem:[%s719_s2 + $0xb0] sm:$0xff] }
   0xd   :  { %462 = vmatpush3.msra.mxu1 %v120_v14  ;;  %488 = vmatprep.mubr.msk.f32.mxu0 %vm538_vm1, %v537_v4  ;;  %v33_v30 = vrot.slane %v27_v29, %v32_v28  ;;  %v422_v37 = vld [vmem:[%s719_s2 + $0xa8] sm:$0xff]  ;;  %v421_v38 = vld [vmem:[%s719_s2 + $0xa0] sm:$0xff]  ;;  %v37_v39 = vrot.slane %v27_v29, %v36_v36  ;;  %v420_v40 = vld [vmem:[%s719_s2 + $0x98] sm:$0xff] }
   0xe   :  { %463 = vmatprep.subr.mxu1 %v537_v4  ;;  %473 = vmatpush3.msra.mxu0 %v415_v18  ;;  %v419_v42 = vld [vmem:[%s719_s2 + $0x90] sm:$0xff]  ;;  %v418_v44 = vld [vmem:[%s719_s2 + $0x88] sm:$0xff]  ;;  %v417_v45 = vld [vmem:[%s719_s2 + $0x80] sm:$0xff]  ;;  %s540_s2 = smov 32  }
   0xf   :  { %464 = vmatpush3.msra.mxu1 %v119_v15  ;;  %474 = vmatprep.subr.mxu0 %v537_v4  ;;  %v28_v50 = vld [vmem:[%s720_s3 + $0x1] sm:$0x3]  ;;  %s541_s3 = smov [#allocation2]  }
  0x10   :  { %465 = vmatprep.subr.mxu1 %v537_v4  ;;  %475 = vmatpush3.msra.mxu0 %v414_v19  ;;  %v378_v52 = vrot.slane %v28_v50, %v32_v28  ;;  %v382_v55 = vrot.slane %v28_v50, %v36_v36  ;;  %s398_s30 = sshll.u32 %s541_s3, 4  ;;  %s399_s30 = int_to_ptr.vmem [resolvable:$true] %s398_s30 }
  0x11   :  { %466 = vmatpush3.msra.mxu1 %v118_v16  ;;  %476 = vmatprep.subr.mxu0 %v537_v4  ;;  %s515_s5 = scalar_lea.vmem %s399_s30, 128  ;;  %p520_p1 = scmp.lt.s32.totalorder %s399_s30, %s399_s30 }
  0x12   :  { %467 = vmatprep.subr.mxu1 %v537_v4  ;;  %477 = vmatpush3.msra.mxu0 %v413_v20  ;;  %p516_p0 = scmp.ne.s32.totalorder %s399_s30, %s515_s5  ;;  %p521_p2 = scmp.lt.s32.totalorder %s515_s5, %s515_s5 }
  0x13   :  { %468 = vmatpush3.msra.mxu1 %v117_v17  ;;  %478 = vmatprep.subr.mxu0 %v537_v4 }
  0x14   :  { %491 = vmatprep.subr.mxu1 %v537_v4  ;;  %479 = vmatpush3.msra.mxu0 %v412_v21  ;;  %p522_p3 = por %p521_p2, %p520_p1 }
  0x15   :  { %480 = vmatprep.subr.mxu0 %v537_v4 }
  0x16   :  { %481 = vmatpush3.msra.mxu0 %v411_v22  ;;  %p523_p4 = pnand %p522_p3, %p516_p0 }
  0x17   :  { %482 = vmatprep.subr.mxu0 %v537_v4 }
  0x18   :  { %483 = vmatpush3.msra.mxu0 %v410_v23 }
  0x19   :  { %484 = vmatprep.subr.mxu0 %v537_v4 }
  0x1a   :  { %485 = vmatpush3.msra.mxu0 %v409_v24 }
  0x1b   :  { %486 = vmatprep.subr.mxu0 %v537_v4 }
  0x1c   :  { %487 = vmatpush3.msra.mxu0 %v408_v25 }
  0xca   :  { %v110_v31 = vpop.f32.mrf.mxu0 }
  0xcb   :  { %v111_v32 = vadd.f32 %v110_v31, %v33_v30 }
  0xcc   :  { %v112_v41 = vpop.f32.mrf.mxu0 }
  0xcd   :  { %v115_v33 = vmax.f32 %v111_v32, 0.0  ;;  %v113_v43 = vadd.f32 %v112_v41, %v37_v39 }
  0xcf   :  { %208 = vrot.lane.b32.xlu0 %v115_v33, %s539_s1  ;;  %470 = vmatmul.mubr.msk.f32.vlgmr.msra.gmra.mxu1 %vm125_vm2, %v115_v33  ;;  %v116_v46 = vmax.f32 %v113_v43, 0.0 }
  0xd0   :  { %492 = vmatpush3.msra.mxu1 %v424_v34  ;;  %507 = vmatprep.mubr.msk.f32.mxu1 %vm538_vm1, %v537_v4 }
  0xd1   :  { %493 = vmatprep.subr.mxu1 %v537_v4 }
  0xd2   :  { %494 = vmatpush3.msra.mxu1 %v423_v35 }
  0xd3   :  { %495 = vmatprep.subr.mxu1 %v537_v4 }
  0xd4   :  { %496 = vmatpush3.msra.mxu1 %v422_v37 }
  0xd5   :  { %497 = vmatprep.subr.mxu1 %v537_v4 }
  0xd6   :  { %498 = vmatpush3.msra.mxu1 %v421_v38 }
  0xd7   :  { %499 = vmatprep.subr.mxu1 %v537_v4 }
  0xd8   :  { %500 = vmatpush3.msra.mxu1 %v420_v40 }
  0xd9   :  { %501 = vmatprep.subr.mxu1 %v537_v4 }
  0xda   :  { %502 = vmatpush3.msra.mxu1 %v419_v42 }
  0xdb   :  { %503 = vmatprep.subr.mxu1 %v537_v4 }
  0xdc   :  { %504 = vmatpush3.msra.mxu1 %v418_v44 }
  0xdd   :  { %505 = vmatprep.subr.mxu1 %v537_v4 }
  0xde   :  { %506 = vmatpush3.msra.mxu1 %v417_v45 }
  0xdf   :  { %508 = vmatmul.mubr.msk.f32.vlgmr.msra.gmra.mxu1 %vm125_vm2, %v116_v46 }
 0x141   :  { %v209_v47 = vpop.permute.xlu0 %208 }
 0x142   :  { %489 = vmatmul.mubr.msk.f32.vlgmr.msra.gmra.mxu0 %vm125_vm2, %v209_v47 }
 0x18f   :  { %v195_v48 = vpop.f32.mrf.mxu1 }
 0x191   :  { %v471_v49 = vpop.f32.mrf.mxu1 }
 0x19f   :  { %v360_v51 = vpop.f32.mrf.mxu1 }
 0x1a0   :  { %369 = vrot.lane.b32.xlu1 %v360_v51, %s539_s1 }
 0x1a1   :  { %v509_v53 = vpop.f32.mrf.mxu1 }
 0x1a4   :  { %383 = vrot.lane.b32.xlu1 %v378_v52, %s539_s1 }
 0x202   :  { %v278_v54 = vpop.f32.mrf.mxu0 }
 0x203   :  { %365 = vrot.lane.b32.xlu0 %v278_v54, %s540_s2 }
 0x204   :  { %v490_v56 = vpop.f32.mrf.mxu0 }
 0x207   :  { %385 = vrot.lane.b32.xlu0 %v382_v55, %s539_s1 }
 0x212   :  { %v370_v57 = vpop.permute.xlu1 %369 }
 0x216   :  { %v384_v60 = vpop.permute.xlu1 %383 }
 0x275   :  { %v366_v58 = vpop.permute.xlu0 %365 }
 0x276   :  { %v372_v59 = vsel %vm40_vm0, %v195_v48, %v366_v58 }
 0x277   :  { %v373_v62 = vsel %vm125_vm2, %v372_v59, %v370_v57 }
 0x279   :  { %v386_v61 = vpop.permute.xlu0 %385 }
 0x27a   :  { %v387_v63 = vsel %vm125_vm2, %v384_v60, %v386_v61 }
 0x27b   :  { %v389_v0 = vadd.f32 %v387_v63, %v373_v62 }
 0x27d   :  { %391 = vst.msk [vmem:[#allocation2] sm:$0xff] %vm390_vm3, %v389_v0 }
 0x27e   :  { %526 = shalt.err (!%p523_p4)
}
 0x27f   :  { %401 = dma.vmem_to_hbm [thread:$0]  %s399_s30, 128, %s721_s4, [#allocation3]  }
 0x280   :  { %535 = dma.done.wait [#allocation3], 128  }
 0x281   :  { %536 = vsyncadd [#allocation3], 4294967168 }
 0x282   :  { %405 = vsyncpa [#allocation3], 1 }

</bundles_post_ra>
